<compile_context>
chip_gen: v7x
topology: tpu7x:2x2x1
jax: 0.10.0
libtpu: 0.0.40
codegen_flags: <defaults>
</compile_context>

<pallas_src>
import math

import jax
import jax.numpy as jnp
from jax import lax
from jax.experimental import pallas as pl
from jax.experimental.pallas import tpu as pltpu

# ---- module hyper-parameters (defaults of InstantNGP.__init__) ----
N_LEVELS = 16
N_FEATURES_PER_LEVEL = 2
LOG2_HASHMAP_SIZE = 19
BASE_RESOLUTION = 16
FINEST_RESOLUTION = 2048
GEO_FEAT_DIM = 15
DENSITY_OUT = 1 + GEO_FEAT_DIM                # 16: [sigma | geo_feat(15)]
HIDDEN_DENSITY = 64                           # num_layers_density=2 -> 1 hidden layer
HIDDEN_COLOR = 64                             # num_layers_color=3   -> 2 hidden layers
SH_DIM = 16                                   # SphericalHarmonics degree 4
COLOR_CHANNELS = 3
OUT_ROWS = 1 + COLOR_CHANNELS                 # merged output rows: [density | r g b]
BOUND = 1.0

ENC_DIM = N_LEVELS * N_FEATURES_PER_LEVEL     # 32
SIGMA_ROWS = 8                                # sigma weight row padded to 8 sublanes

MAX_TILE_N = 8192                             # v7x: 64 MiB VMEM -> keep headroom
VMEM_LIMIT_BYTES = 32 * 1024 * 1024           # explicit (v5e default is only 16 MiB)


# ----------------------------------------------------------------------------
# Pallas kernel: density MLP, softplus, direction normalize + SH-4, color MLP.
# Feature-major: enc (32, TN) bf16, d (3, TN) f32, weights (out, in) bf16,
# output (4, TN) f32.  All matmuls bf16 on the MXU with f32 accumulation.
# ----------------------------------------------------------------------------
def ngp_kernel(enc_ref, d_ref, wd1_ref, wd2sig_ref, wc1sh_ref, wc1g_ref,
               wc2_ref, wc3_ref, out_ref):
    # --- density net hidden layer: relu(Wd1 @ enc) -> (64, TN) bf16 ---
    enc = enc_ref[...]                                                     # (32,TN) bf16
    h = jnp.dot(wd1_ref[...], enc, preferred_element_type=jnp.float32)     # (64,TN) f32
    h = jnp.maximum(h, 0.0).astype(jnp.bfloat16)                           # (64,TN) bf16

    # --- sigma / density: only the sigma row of Wd2 (padded to 8 rows) ---
    sig = jnp.dot(wd2sig_ref[...], h, preferred_element_type=jnp.float32)  # (8,TN)
    density = jnp.logaddexp(sig[0:1, :], 0.0)                              # softplus (1,TN)

    # --- direction: F.normalize, then SH degree-4 basis assembled in registers ---
    dvec = d_ref[...]                                                      # (3,TN) f32
    sumsq = jnp.sum(dvec * dvec, axis=0, keepdims=True)                    # (1,TN)
    inv = lax.rsqrt(jnp.maximum(sumsq, 1e-24))                             # 1/max(|d|,1e-12)
    dn = dvec * inv                                                        # (3,TN) normalized
    sq = dn * dn                                                           # one (3,TN) mul
    x, y, z = dn[0:1, :], dn[1:2, :], dn[2:3, :]
    xx, yy, zz = sq[0:1, :], sq[1:2, :], sq[2:3, :]
    xy, yz, xz = x * y, y * z, x * z

    sh_rows = [
        jnp.full_like(x, 0.28209479177387814),
        -0.48860251190291987 * y,
        0.48860251190291987 * z,
        -0.48860251190291987 * x,
        1.0925484305920792 * xy,
        -1.0925484305920792 * yz,
        0.94617469575755997 * zz - 0.31539156525251999,
        -1.0925484305920792 * xz,
        0.54627421529603959 * (xx - yy),
        0.59004358992664352 * y * (-3.0 * xx + yy),
        2.8906114426405538 * xy * z,
        0.45704579946446572 * y * (1.0 - 5.0 * zz),
        0.3731763325901154 * z * (5.0 * zz - 3.0),
        0.45704579946446572 * x * (1.0 - 5.0 * zz),
        1.4453057213202769 * z * (xx - yy),
        0.59004358992664352 * x * (-xx + 3.0 * yy),
    ]
    # single in-register sublane concat + one bf16 cast (no scratch round trip)
    sh = jnp.concatenate(sh_rows, axis=0).astype(jnp.bfloat16)             # (16,TN) bf16

    # --- color net: first layer = Wsh @ sh + Wfused @ h, where
    #     Wfused = wc1_geo @ wd2[1:] was pre-composed in the wrapper (the
    #     geo_feat hand-off has no activation), then 64 ReLU -> 64 ReLU -> 3 ---
    c = (jnp.dot(wc1sh_ref[...], sh, preferred_element_type=jnp.float32) +
         jnp.dot(wc1g_ref[...], h, preferred_element_type=jnp.float32))    # (64,TN)
    c = jnp.maximum(c, 0.0).astype(jnp.bfloat16)
    c = jnp.dot(wc2_ref[...], c, preferred_element_type=jnp.float32)
    c = jnp.maximum(c, 0.0).astype(jnp.bfloat16)
    color = jnp.dot(wc3_ref[...], c, preferred_element_type=jnp.float32)   # (3,TN)

    # two lane-dense row-range stores (no sublane concat of a (4,TN) value)
    out_ref[0:1, :] = density
    out_ref[1:OUT_ROWS, :] = color


# ----------------------------------------------------------------------------
# Hash-grid encoding (plain JAX), emitting feature-major (32, N) bf16 directly.
# TODO(synk): the per-level 2^19-entry data-dependent gather has no clean Pallas
# TPU equivalent here; a follow-up could keep bf16 tables VMEM-resident on
# v5e/v6e (32 MB total) and stream levels via make_async_copy on v7x.
# TODO(synk): tinycudann uses direct (non-hashed) indexing for coarse levels
# whose grid fits in the table; we always hash, so numerics differ slightly.
# ----------------------------------------------------------------------------
def hash_grid_encode(x01, tables):
    n = x01.shape[0]
    hashmap_size = tables.shape[1]
    per_level_scale = (FINEST_RESOLUTION / BASE_RESOLUTION) ** (1.0 / (N_LEVELS - 1))
    primes = jnp.array([1, 2654435761, 805459861], dtype=jnp.uint32)
    x01 = jnp.clip(x01, 0.0, 1.0)

    feats = []
    for lvl in range(N_LEVELS):
        scale = BASE_RESOLUTION * (per_level_scale ** lvl) - 1.0
        pos = x01 * scale + 0.5
        grid = jnp.floor(pos)
        frac = pos - grid
        grid = grid.astype(jnp.uint32)
        level_feat = jnp.zeros((n, N_FEATURES_PER_LEVEL), jnp.float32)
        for corner in range(8):
            offs = jnp.array([(corner >> 0) & 1, (corner >> 1) & 1, (corner >> 2) & 1],
                             dtype=jnp.uint32)
            c = grid + offs[None, :]
            idx = (c[:, 0] * primes[0]) ^ (c[:, 1] * primes[1]) ^ (c[:, 2] * primes[2])
            idx = idx & jnp.uint32(hashmap_size - 1)
            w = jnp.prod(
                jnp.where(offs[None, :] == 1, frac, 1.0 - frac), axis=-1, keepdims=True)
            level_feat = level_feat + w * tables[lvl][idx]
        feats.append(level_feat.T)                                          # (2, N)
    return jnp.concatenate(feats, axis=0).astype(jnp.bfloat16)              # (32, N) bf16


# ----------------------------------------------------------------------------
# Wrapper: tile sizing, padding folded into the encoder input, pallas_call.
# ----------------------------------------------------------------------------
def _round_up(v, m):
    return -(-v // m) * m


def instant_ngp_forward(x, d, params, tile_n=4096):
    batch_shape = x.shape[:-1]
    xf = x.reshape(-1, 3).astype(jnp.float32)
    df = d.reshape(-1, 3).astype(jnp.float32)
    n = xf.shape[0]

    # tile sizing: large lane tiles (amortize ~0.35us/grid-step), capped for
    # v7x's 64 MiB VMEM, and forced to >=2 grid steps when the problem allows
    # it so the "parallel" axis can shard across v7x's two TensorCores.
    tile_n = _round_up(max(min(tile_n, MAX_TILE_N), 128), 128)
    n128 = _round_up(n, 128)
    tile_n = min(tile_n, n128)
    if tile_n >= n128 and n128 >= 256:
        tile_n = _round_up(n128 // 2, 128)
    n_pad = _round_up(n, tile_n)

    # pad once, up front, so downstream producers emit the padded layout directly
    if n_pad != n:
        xf = jnp.pad(xf, ((0, n_pad - n), (0, 0)))
        df = jnp.pad(df, ((0, n_pad - n), (0, 0)))

    # hash-grid encoding (plain JAX, data-dependent gather), feature-major bf16
    x01 = (xf + BOUND) / (2.0 * BOUND)
    enc_t = hash_grid_encode(x01, params["hash_tables"])                   # (32, n_pad)
    d_t = df.T                                                             # (3,  n_pad)

    full = lambda i: (0, 0)
    out = pl.pallas_call(
        ngp_kernel,
        out_shape=jax.ShapeDtypeStruct((OUT_ROWS, n_pad), jnp.float32),
        grid_spec=pltpu.PrefetchScalarGridSpec(
            num_scalar_prefetch=0,
            grid=(n_pad // tile_n,),
            in_specs=[
                pl.BlockSpec((ENC_DIM, tile_n), lambda i: (0, i)),
                pl.BlockSpec((3, tile_n), lambda i: (0, i)),
                pl.BlockSpec((HIDDEN_DENSITY, ENC_DIM), full),
                pl.BlockSpec((SIGMA_ROWS, HIDDEN_DENSITY), full),
                pl.BlockSpec((HIDDEN_COLOR, SH_DIM), full),
                pl.BlockSpec((HIDDEN_COLOR, HIDDEN_DENSITY), full),
                pl.BlockSpec((HIDDEN_COLOR, HIDDEN_COLOR), full),
                pl.BlockSpec((COLOR_CHANNELS, HIDDEN_COLOR), full),
            ],
            out_specs=pl.BlockSpec((OUT_ROWS, tile_n), lambda i: (0, i)),
        ),
        compiler_params=pltpu.CompilerParams(
            dimension_semantics=("parallel",),
            vmem_limit_bytes=VMEM_LIMIT_BYTES),
    )(enc_t, d_t, params["wd1"], params["wd2_sig"],
      params["wc1_sh"], params["wc1_geo_fused"], params["wc2"], params["wc3"])

    density = out[0, :n].reshape(batch_shape)
    color = out[1:, :n].T.reshape(*batch_shape, COLOR_CHANNELS)
    return color, density


# ----------------------------------------------------------------------------
# Deterministic parameter init (shapes follow InstantNGP.__init__ defaults).
# Weights stored (out_features, in_features); the geo_feat -> color-net hand-off
# is folded into a single (64, 64) weight composed in f32, cast to bf16 once.
# ----------------------------------------------------------------------------
def init_params(key):
    ks = jax.random.split(key, 7)
    hashmap_size = 2 ** LOG2_HASHMAP_SIZE

    def lin(k, fan_out, fan_in, init_fan_in=None):
        fi = fan_in if init_fan_in is None else init_fan_in
        s = math.sqrt(6.0 / (fi + fan_out))
        return jax.random.uniform(k, (fan_out, fan_in), jnp.float32, -s, s)

    color_in = SH_DIM + GEO_FEAT_DIM                                       # 31
    wd1 = lin(ks[1], HIDDEN_DENSITY, ENC_DIM)                              # (64, 32)
    wd2 = lin(ks[2], DENSITY_OUT, HIDDEN_DENSITY)                          # (16, 64)
    wc1_sh = lin(ks[3], HIDDEN_COLOR, SH_DIM, init_fan_in=color_in)        # (64, 16)
    wc1_geo = lin(ks[4], HIDDEN_COLOR, GEO_FEAT_DIM, init_fan_in=color_in) # (64, 15)
    wc2 = lin(ks[5], HIDDEN_COLOR, HIDDEN_COLOR)                           # (64, 64)
    wc3 = lin(ks[6], COLOR_CHANNELS, HIDDEN_COLOR)                         # (3,  64)

    # geo_feat = wd2[1:] @ h feeds the color net with no activation in between,
    # so fold the two linear maps (compose in f32, single bf16 cast).
    wc1_geo_fused = wc1_geo @ wd2[1:, :]                                   # (64, 64)
    # sigma row of the density head, zero-padded to 8 rows for a clean MXU op
    wd2_sig = jnp.zeros((SIGMA_ROWS, HIDDEN_DENSITY), jnp.float32).at[0].set(wd2[0])

    return {
        "hash_tables": jax.random.uniform(
            ks[0], (N_LEVELS, hashmap_size, N_FEATURES_PER_LEVEL),
            jnp.float32, -1e-4, 1e-4),
        "wd1": wd1.astype(jnp.bfloat16),
        "wd2_sig": wd2_sig.astype(jnp.bfloat16),
        "wc1_sh": wc1_sh.astype(jnp.bfloat16),
        "wc1_geo_fused": wc1_geo_fused.astype(jnp.bfloat16),
        "wc2": wc2.astype(jnp.bfloat16),
        "wc3": wc3.astype(jnp.bfloat16),
    }


if __name__ == "__main__":
    key = jax.random.PRNGKey(0)
    kx, kd, kp = jax.random.split(key, 3)

    batch_shape = (2, 192)                       # N = 384 points -> 2 grid tiles of 256
    x = jax.random.uniform(kx, (*batch_shape, 3), jnp.float32, -1.0, 1.0)
    d = jax.random.normal(kd, (*batch_shape, 3), jnp.float32)
    params = init_params(kp)

    fwd = jax.jit(instant_ngp_forward)
    color, density = fwd(x, d, params)
    jax.block_until_ready((color, density))

    assert color.shape == (*batch_shape, COLOR_CHANNELS)
    assert density.shape == batch_shape
    assert jnp.all(jnp.isfinite(color)) and jnp.all(jnp.isfinite(density))
    assert jnp.all(density >= 0.0)               # softplus output
    print("KERNEL_OK")
</pallas_src>

<mosaic_0001>
module attributes {stable_mosaic.version = 11 : i64} {
  func.func @ngp_kernel(%arg0: i32, %arg1: memref<32x256xbf16, #tpu.memory_space<vmem>>, %arg2: memref<3x256xf32, #tpu.memory_space<vmem>>, %arg3: memref<64x32xbf16, #tpu.memory_space<vmem>>, %arg4: memref<8x64xbf16, #tpu.memory_space<vmem>>, %arg5: memref<64x16xbf16, #tpu.memory_space<vmem>>, %arg6: memref<64x64xbf16, #tpu.memory_space<vmem>>, %arg7: memref<64x64xbf16, #tpu.memory_space<vmem>>, %arg8: memref<3x64xbf16, #tpu.memory_space<vmem>>, %arg9: memref<4x256xf32, #tpu.memory_space<vmem>>) attributes {dimension_semantics = [#tpu.dimension_semantics<parallel>], iteration_bounds = array<i64: 2>, scalar_prefetch = 0 : i64, scratch_operands = 0 : i64, tpu.core_type = #tpu.core_type<tc>, window_params = [{transform_indices = @transform_0, window_bounds = array<i64: 32, 256>}, {transform_indices = @transform_1, window_bounds = array<i64: 3, 256>}, {pipeline_mode = #tpu.pipeline_mode<synchronous>, transform_indices = @transform_2, window_bounds = array<i64: 64, 32>}, {pipeline_mode = #tpu.pipeline_mode<synchronous>, transform_indices = @transform_3, window_bounds = array<i64: 8, 64>}, {pipeline_mode = #tpu.pipeline_mode<synchronous>, transform_indices = @transform_4, window_bounds = array<i64: 64, 16>}, {pipeline_mode = #tpu.pipeline_mode<synchronous>, transform_indices = @transform_5, window_bounds = array<i64: 64, 64>}, {pipeline_mode = #tpu.pipeline_mode<synchronous>, transform_indices = @transform_6, window_bounds = array<i64: 64, 64>}, {pipeline_mode = #tpu.pipeline_mode<synchronous>, transform_indices = @transform_7, window_bounds = array<i64: 3, 64>}, {transform_indices = @transform_8, window_bounds = array<i64: 4, 256>}]} {
    %c0 = arith.constant 0 : index
    %c0_0 = arith.constant 0 : index
    %0 = vector.load %arg1[%c0, %c0_0] : memref<32x256xbf16, #tpu.memory_space<vmem>>, vector<32x256xbf16>
    %c0_1 = arith.constant 0 : index
    %c0_2 = arith.constant 0 : index
    %1 = vector.load %arg3[%c0_1, %c0_2] : memref<64x32xbf16, #tpu.memory_space<vmem>>, vector<64x32xbf16>
    %cst = arith.constant dense<0.000000e+00> : vector<64x256xf32>
    %2 = tpu.matmul %1, %0, %cst {dimension_numbers = #tpu.dot_dimension_numbers<[1], [0], [0], [1], [0, 0, 1, 1], [], []>} : vector<64x32xbf16>, vector<32x256xbf16>, vector<64x256xf32> -> vector<64x256xf32>
    %cst_3 = arith.constant 0.000000e+00 : f32
    %3 = vector.broadcast %cst_3 : f32 to vector<64x256xf32>
    %4 = arith.maximumf %2, %3 : vector<64x256xf32>
    %5 = arith.truncf %4 : vector<64x256xf32> to vector<64x256xbf16>
    %c0_4 = arith.constant 0 : index
    %c0_5 = arith.constant 0 : index
    %6 = vector.load %arg4[%c0_4, %c0_5] : memref<8x64xbf16, #tpu.memory_space<vmem>>, vector<8x64xbf16>
    %cst_6 = arith.constant dense<0.000000e+00> : vector<8x256xf32>
    %7 = tpu.matmul %6, %5, %cst_6 {dimension_numbers = #tpu.dot_dimension_numbers<[1], [0], [0], [1], [0, 0, 1, 1], [], []>} : vector<8x64xbf16>, vector<64x256xbf16>, vector<8x256xf32> -> vector<8x256xf32>
    %8 = vector.extract_strided_slice %7 {offsets = [0, 0], sizes = [1, 256], strides = [1, 1]} : vector<8x256xf32> to vector<1x256xf32>
    %cst_7 = arith.constant 0.000000e+00 : f32
    %9 = vector.broadcast %cst_7 : f32 to vector<1x256xf32>
    %10 = arith.maximumf %8, %9 : vector<1x256xf32>
    %11 = vector.broadcast %cst_7 : f32 to vector<1x256xf32>
    %12 = arith.subf %8, %11 : vector<1x256xf32>
    %13 = arith.cmpf one, %12, %12 : vector<1x256xf32>
    %14 = vector.broadcast %cst_7 : f32 to vector<1x256xf32>
    %15 = arith.addf %8, %14 : vector<1x256xf32>
    %16 = math.absf %12 : vector<1x256xf32>
    %cst_8 = arith.constant 0.000000e+00 : f32
    %17 = vector.broadcast %cst_8 : f32 to vector<1x256xf32>
    %18 = arith.subf %17, %16 : vector<1x256xf32>
    %19 = math.exp %18 : vector<1x256xf32>
    %20 = math.log1p %19 : vector<1x256xf32>
    %21 = arith.addf %10, %20 : vector<1x256xf32>
    %22 = arith.select %13, %15, %21 : vector<1x256xi1>, vector<1x256xf32>
    %c0_9 = arith.constant 0 : index
    %c0_10 = arith.constant 0 : index
    %23 = vector.load %arg2[%c0_9, %c0_10] : memref<3x256xf32, #tpu.memory_space<vmem>>, vector<3x256xf32>
    %24 = arith.mulf %23, %23 : vector<3x256xf32>
    %cst_11 = arith.constant dense<0.000000e+00> : vector<256xf32>
    %25 = vector.multi_reduction <add>, %24, %cst_11 [0] : vector<3x256xf32> to vector<256xf32>
    %26 = vector.shape_cast %25 : vector<256xf32> to vector<1x256xf32>
    %cst_12 = arith.constant 1.000000e-24 : f32
    %27 = vector.broadcast %cst_12 : f32 to vector<1x256xf32>
    %28 = arith.maximumf %26, %27 : vector<1x256xf32>
    %29 = math.rsqrt %28 : vector<1x256xf32>
    %30 = vector.broadcast %29 : vector<1x256xf32> to vector<3x256xf32>
    %31 = arith.mulf %23, %30 : vector<3x256xf32>
    %32 = arith.mulf %31, %31 : vector<3x256xf32>
    %33 = vector.extract_strided_slice %31 {offsets = [0, 0], sizes = [1, 256], strides = [1, 1]} : vector<3x256xf32> to vector<1x256xf32>
    %34 = vector.extract_strided_slice %31 {offsets = [1, 0], sizes = [1, 256], strides = [1, 1]} : vector<3x256xf32> to vector<1x256xf32>
    %35 = vector.extract_strided_slice %31 {offsets = [2, 0], sizes = [1, 256], strides = [1, 1]} : vector<3x256xf32> to vector<1x256xf32>
    %36 = vector.extract_strided_slice %32 {offsets = [0, 0], sizes = [1, 256], strides = [1, 1]} : vector<3x256xf32> to vector<1x256xf32>
    %37 = vector.extract_strided_slice %32 {offsets = [1, 0], sizes = [1, 256], strides = [1, 1]} : vector<3x256xf32> to vector<1x256xf32>
    %38 = vector.extract_strided_slice %32 {offsets = [2, 0], sizes = [1, 256], strides = [1, 1]} : vector<3x256xf32> to vector<1x256xf32>
    %39 = arith.mulf %33, %34 : vector<1x256xf32>
    %40 = arith.mulf %34, %35 : vector<1x256xf32>
    %41 = arith.mulf %33, %35 : vector<1x256xf32>
    %cst_13 = arith.constant 0.282094806 : f32
    %42 = vector.broadcast %cst_13 : f32 to vector<1x256xf32>
    %cst_14 = arith.constant -0.488602519 : f32
    %43 = vector.broadcast %cst_14 : f32 to vector<1x256xf32>
    %44 = arith.mulf %43, %34 : vector<1x256xf32>
    %cst_15 = arith.constant 0.488602519 : f32
    %45 = vector.broadcast %cst_15 : f32 to vector<1x256xf32>
    %46 = arith.mulf %45, %35 : vector<1x256xf32>
    %cst_16 = arith.constant -0.488602519 : f32
    %47 = vector.broadcast %cst_16 : f32 to vector<1x256xf32>
    %48 = arith.mulf %47, %33 : vector<1x256xf32>
    %cst_17 = arith.constant 1.09254849 : f32
    %49 = vector.broadcast %cst_17 : f32 to vector<1x256xf32>
    %50 = arith.mulf %49, %39 : vector<1x256xf32>
    %cst_18 = arith.constant -1.09254849 : f32
    %51 = vector.broadcast %cst_18 : f32 to vector<1x256xf32>
    %52 = arith.mulf %51, %40 : vector<1x256xf32>
    %cst_19 = arith.constant 0.946174681 : f32
    %53 = vector.broadcast %cst_19 : f32 to vector<1x256xf32>
    %54 = arith.mulf %53, %38 : vector<1x256xf32>
    %cst_20 = arith.constant 0.31539157 : f32
    %55 = vector.broadcast %cst_20 : f32 to vector<1x256xf32>
    %56 = arith.subf %54, %55 : vector<1x256xf32>
    %cst_21 = arith.constant -1.09254849 : f32
    %57 = vector.broadcast %cst_21 : f32 to vector<1x256xf32>
    %58 = arith.mulf %57, %41 : vector<1x256xf32>
    %59 = arith.subf %36, %37 : vector<1x256xf32>
    %cst_22 = arith.constant 0.546274245 : f32
    %60 = vector.broadcast %cst_22 : f32 to vector<1x256xf32>
    %61 = arith.mulf %60, %59 : vector<1x256xf32>
    %cst_23 = arith.constant 0.590043604 : f32
    %62 = vector.broadcast %cst_23 : f32 to vector<1x256xf32>
    %63 = arith.mulf %62, %34 : vector<1x256xf32>
    %cst_24 = arith.constant -3.000000e+00 : f32
    %64 = vector.broadcast %cst_24 : f32 to vector<1x256xf32>
    %65 = arith.mulf %64, %36 : vector<1x256xf32>
    %66 = arith.addf %65, %37 : vector<1x256xf32>
    %67 = arith.mulf %63, %66 : vector<1x256xf32>
    %cst_25 = arith.constant 2.89061141 : f32
    %68 = vector.broadcast %cst_25 : f32 to vector<1x256xf32>
    %69 = arith.mulf %68, %39 : vector<1x256xf32>
    %70 = arith.mulf %69, %35 : vector<1x256xf32>
    %cst_26 = arith.constant 0.457045794 : f32
    %71 = vector.broadcast %cst_26 : f32 to vector<1x256xf32>
    %72 = arith.mulf %71, %34 : vector<1x256xf32>
    %cst_27 = arith.constant 5.000000e+00 : f32
    %73 = vector.broadcast %cst_27 : f32 to vector<1x256xf32>
    %74 = arith.mulf %73, %38 : vector<1x256xf32>
    %cst_28 = arith.constant 1.000000e+00 : f32
    %75 = vector.broadcast %cst_28 : f32 to vector<1x256xf32>
    %76 = arith.subf %75, %74 : vector<1x256xf32>
    %77 = arith.mulf %72, %76 : vector<1x256xf32>
    %cst_29 = arith.constant 0.373176336 : f32
    %78 = vector.broadcast %cst_29 : f32 to vector<1x256xf32>
    %79 = arith.mulf %78, %35 : vector<1x256xf32>
    %cst_30 = arith.constant 5.000000e+00 : f32
    %80 = vector.broadcast %cst_30 : f32 to vector<1x256xf32>
    %81 = arith.mulf %80, %38 : vector<1x256xf32>
    %cst_31 = arith.constant 3.000000e+00 : f32
    %82 = vector.broadcast %cst_31 : f32 to vector<1x256xf32>
    %83 = arith.subf %81, %82 : vector<1x256xf32>
    %84 = arith.mulf %79, %83 : vector<1x256xf32>
    %cst_32 = arith.constant 0.457045794 : f32
    %85 = vector.broadcast %cst_32 : f32 to vector<1x256xf32>
    %86 = arith.mulf %85, %33 : vector<1x256xf32>
    %cst_33 = arith.constant 5.000000e+00 : f32
    %87 = vector.broadcast %cst_33 : f32 to vector<1x256xf32>
    %88 = arith.mulf %87, %38 : vector<1x256xf32>
    %cst_34 = arith.constant 1.000000e+00 : f32
    %89 = vector.broadcast %cst_34 : f32 to vector<1x256xf32>
    %90 = arith.subf %89, %88 : vector<1x256xf32>
    %91 = arith.mulf %86, %90 : vector<1x256xf32>
    %cst_35 = arith.constant 1.44530571 : f32
    %92 = vector.broadcast %cst_35 : f32 to vector<1x256xf32>
    %93 = arith.mulf %92, %35 : vector<1x256xf32>
    %94 = arith.subf %36, %37 : vector<1x256xf32>
    %95 = arith.mulf %93, %94 : vector<1x256xf32>
    %cst_36 = arith.constant 0.590043604 : f32
    %96 = vector.broadcast %cst_36 : f32 to vector<1x256xf32>
    %97 = arith.mulf %96, %33 : vector<1x256xf32>
    %cst_37 = arith.constant 0.000000e+00 : f32
    %98 = vector.broadcast %cst_37 : f32 to vector<1x256xf32>
    %99 = arith.subf %98, %36 : vector<1x256xf32>
    %cst_38 = arith.constant 3.000000e+00 : f32
    %100 = vector.broadcast %cst_38 : f32 to vector<1x256xf32>
    %101 = arith.mulf %100, %37 : vector<1x256xf32>
    %102 = arith.addf %99, %101 : vector<1x256xf32>
    %103 = arith.mulf %97, %102 : vector<1x256xf32>
    %104 = tpu.concatenate %42, %44, %46, %48, %50, %52, %56, %58, %61, %67, %70, %77, %84, %91, %95, %103 in 0 : vector<1x256xf32>, vector<1x256xf32>, vector<1x256xf32>, vector<1x256xf32>, vector<1x256xf32>, vector<1x256xf32>, vector<1x256xf32>, vector<1x256xf32>, vector<1x256xf32>, vector<1x256xf32>, vector<1x256xf32>, vector<1x256xf32>, vector<1x256xf32>, vector<1x256xf32>, vector<1x256xf32>, vector<1x256xf32> -> vector<16x256xf32>
    %105 = arith.truncf %104 : vector<16x256xf32> to vector<16x256xbf16>
    %c0_39 = arith.constant 0 : index
    %c0_40 = arith.constant 0 : index
    %106 = vector.load %arg5[%c0_39, %c0_40] : memref<64x16xbf16, #tpu.memory_space<vmem>>, vector<64x16xbf16>
    %cst_41 = arith.constant dense<0.000000e+00> : vector<64x256xf32>
    %107 = tpu.matmul %106, %105, %cst_41 {dimension_numbers = #tpu.dot_dimension_numbers<[1], [0], [0], [1], [0, 0, 1, 1], [], []>} : vector<64x16xbf16>, vector<16x256xbf16>, vector<64x256xf32> -> vector<64x256xf32>
    %c0_42 = arith.constant 0 : index
    %c0_43 = arith.constant 0 : index
    %108 = vector.load %arg6[%c0_42, %c0_43] : memref<64x64xbf16, #tpu.memory_space<vmem>>, vector<64x64xbf16>
    %cst_44 = arith.constant dense<0.000000e+00> : vector<64x256xf32>
    %109 = tpu.matmul %108, %5, %cst_44 {dimension_numbers = #tpu.dot_dimension_numbers<[1], [0], [0], [1], [0, 0, 1, 1], [], []>} : vector<64x64xbf16>, vector<64x256xbf16>, vector<64x256xf32> -> vector<64x256xf32>
    %110 = arith.addf %107, %109 : vector<64x256xf32>
    %cst_45 = arith.constant 0.000000e+00 : f32
    %111 = vector.broadcast %cst_45 : f32 to vector<64x256xf32>
    %112 = arith.maximumf %110, %111 : vector<64x256xf32>
    %113 = arith.truncf %112 : vector<64x256xf32> to vector<64x256xbf16>
    %c0_46 = arith.constant 0 : index
    %c0_47 = arith.constant 0 : index
    %114 = vector.load %arg7[%c0_46, %c0_47] : memref<64x64xbf16, #tpu.memory_space<vmem>>, vector<64x64xbf16>
    %cst_48 = arith.constant dense<0.000000e+00> : vector<64x256xf32>
    %115 = tpu.matmul %114, %113, %cst_48 {dimension_numbers = #tpu.dot_dimension_numbers<[1], [0], [0], [1], [0, 0, 1, 1], [], []>} : vector<64x64xbf16>, vector<64x256xbf16>, vector<64x256xf32> -> vector<64x256xf32>
    %cst_49 = arith.constant 0.000000e+00 : f32
    %116 = vector.broadcast %cst_49 : f32 to vector<64x256xf32>
    %117 = arith.maximumf %115, %116 : vector<64x256xf32>
    %118 = arith.truncf %117 : vector<64x256xf32> to vector<64x256xbf16>
    %c0_50 = arith.constant 0 : index
    %c0_51 = arith.constant 0 : index
    %119 = vector.load %arg8[%c0_50, %c0_51] : memref<3x64xbf16, #tpu.memory_space<vmem>>, vector<3x64xbf16>
    %cst_52 = arith.constant dense<0.000000e+00> : vector<3x256xf32>
    %120 = tpu.matmul %119, %118, %cst_52 {dimension_numbers = #tpu.dot_dimension_numbers<[1], [0], [0], [1], [0, 0, 1, 1], [], []>} : vector<3x64xbf16>, vector<64x256xbf16>, vector<3x256xf32> -> vector<3x256xf32>
    %c0_53 = arith.constant 0 : index
    %c0_54 = arith.constant 0 : index
    %121 = vector.load %arg9[%c0_53, %c0_54] : memref<4x256xf32, #tpu.memory_space<vmem>>, vector<1x256xf32>
    tpu.vector_store %arg9[%c0_53, %c0_54], %22 {strides = array<i32>} : memref<4x256xf32, #tpu.memory_space<vmem>>, vector<1x256xf32>,
    %c1 = arith.constant 1 : index
    %c0_55 = arith.constant 0 : index
    %122 = vector.load %arg9[%c1, %c0_55] : memref<4x256xf32, #tpu.memory_space<vmem>>, vector<3x256xf32>
    tpu.vector_store %arg9[%c1, %c0_55], %120 {strides = array<i32>} : memref<4x256xf32, #tpu.memory_space<vmem>>, vector<3x256xf32>,
    return
  }
  func.func @transform_0(%arg0: i32) -> (i32, i32) {
    %c0_i32 = arith.constant 0 : i32
    %c0_i32_0 = arith.constant 0 : i32
    return %c0_i32, %arg0 : i32, i32
  }
  func.func @transform_1(%arg0: i32) -> (i32, i32) {
    %c0_i32 = arith.constant 0 : i32
    %c0_i32_0 = arith.constant 0 : i32
    return %c0_i32, %arg0 : i32, i32
  }
  func.func @transform_2(%arg0: i32) -> (i32, i32) {
    %c0_i32 = arith.constant 0 : i32
    %c0_i32_0 = arith.constant 0 : i32
    %c0_i32_1 = arith.constant 0 : i32
    return %c0_i32, %c0_i32_0 : i32, i32
  }
  func.func @transform_3(%arg0: i32) -> (i32, i32) {
    %c0_i32 = arith.constant 0 : i32
    %c0_i32_0 = arith.constant 0 : i32
    %c0_i32_1 = arith.constant 0 : i32
    return %c0_i32, %c0_i32_0 : i32, i32
  }
  func.func @transform_4(%arg0: i32) -> (i32, i32) {
    %c0_i32 = arith.constant 0 : i32
    %c0_i32_0 = arith.constant 0 : i32
    %c0_i32_1 = arith.constant 0 : i32
    return %c0_i32, %c0_i32_0 : i32, i32
  }
  func.func @transform_5(%arg0: i32) -> (i32, i32) {
    %c0_i32 = arith.constant 0 : i32
    %c0_i32_0 = arith.constant 0 : i32
    %c0_i32_1 = arith.constant 0 : i32
    return %c0_i32, %c0_i32_0 : i32, i32
  }
  func.func @transform_6(%arg0: i32) -> (i32, i32) {
    %c0_i32 = arith.constant 0 : i32
    %c0_i32_0 = arith.constant 0 : i32
    %c0_i32_1 = arith.constant 0 : i32
    return %c0_i32, %c0_i32_0 : i32, i32
  }
  func.func @transform_7(%arg0: i32) -> (i32, i32) {
    %c0_i32 = arith.constant 0 : i32
    %c0_i32_0 = arith.constant 0 : i32
    %c0_i32_1 = arith.constant 0 : i32
    return %c0_i32, %c0_i32_0 : i32, i32
  }
  func.func @transform_8(%arg0: i32) -> (i32, i32) {
    %c0_i32 = arith.constant 0 : i32
    %c0_i32_0 = arith.constant 0 : i32
    return %c0_i32, %arg0 : i32, i32
  }
}

</mosaic_0001>

<bundles_post_ra>
// kernel: instant_ngp_forward.1
= control target key start
LH: loop header
LB: loop body
LE: loop exit
PB: predicated region body
PF: predicated region fallthrough
CT: control target
= control target key end

     0   :  { %s1654_s27 = smov 0   ;;  %s1656_s28 = smov 0   ;;  %s1962_s0 = inlined_call_operand.vmem [shape: bf16[32,512], index: 0, kind: input, shape index: {}]   ;;  %s1963_s1 = inlined_call_operand.vmem [shape: f32[3,512], index: 1, kind: input, shape index: {}]   ;;  %s1964_s2 = inlined_call_operand.vmem [shape: bf16[64,32], index: 2, kind: input, shape index: {}]   ;;  %s1965_s3 = inlined_call_operand.vmem [shape: bf16[8,64], index: 3, kind: input, shape index: {}]   ;;  %s1966_s4 = inlined_call_operand.vmem [shape: bf16[64,16], index: 4, kind: input, shape index: {}]   ;;  %s1967_s5 = inlined_call_operand.vmem [shape: bf16[64,64], index: 5, kind: input, shape index: {}]   ;;  %s1968_s6 = inlined_call_operand.vmem [shape: bf16[64,64], index: 6, kind: input, shape index: {}]   ;;  %s1969_s7 = inlined_call_operand.vmem [shape: bf16[3,64], index: 7, kind: input, shape index: {}]   ;;  %s1970_s8 = inlined_call_operand.vmem [shape: f32[4,512], index: 8, kind: output, shape index: {}]  }
   0x1   :  { %s1658_s29 = smov 0  }
   0x2 LB: > { %s1447_s30 = sadd.s32 4294967295, %s1605_s29   ;;  %s1671_s9 = sadd.s32 1, %s1605_s29   ;;  %s1605_s29 = sphi %s1658_s29, %s1973_s29   ;;  %s1601_s28 = sphi %s1656_s28, %s1972_s28   ;;  %s1597_s27 = sphi %s1654_s27, %s1971_s27  }
   0x3   : > { %s22_s10 = ssub.s32 %s1605_s29, %s1671_s9  ;;  %s25_s11 = sadd.s32 1, %s1601_s28 }
   0x4   : > { %p23_p0 = scmp.eq.s32.totalorder %s22_s10, 0  ;;  %p32_p1 = scmp.ne.s32.totalorder %s1601_s28, %s1597_s27 }
   0x5   : > { %p33_p2 = scmp.eq.s32.totalorder %s1605_s29, 0  ;;  %p1450_p4 = scmp.ge.s32.totalorder %s1605_s29, 2 }
   0x6   : > { %s1680_s12 = scalar_select %p23_p0, %s1601_s28, %s25_s11  }
   0x7   : > { %p34_p3 = por %p33_p2, %p32_p1  ;;  %254 = sbr.rel (%p1450_p4) target bundleno = 21 (0x15), region = 40 }
   0xe   : > { %257 = sbr.rel (!%p34_p3) target bundleno = 21 (0x15), region = 44  ;;  %s259_s13 = sand.u32 (%p34_p3), 1, %s1601_s28  }
   0xf   : > { %s1506_s14 = sshll.u32 (%p34_p3), %s1605_s29, 3  ;;  %s1451_s15 = sshll.u32 (%p34_p3), %s259_s13, 5 }
  0x10   : > { %s264_s18 = scalar_lea.vmem (%p34_p3), %s1962_s0, %s1506_s14  ;;  %s261_s19 = scalar_lea.vmem (%p34_p3), [#allocation2], %s1451_s15 }
  0x11   : > { %v298_v0 = vld [vmem:[%s264_s18] sm:$0xff] (%p34_p3)  ;;  %v300_v1 = vld [vmem:[%s264_s18 + $0x10] sm:$0xff] (%p34_p3) }
  0x12   : > { %v302_v2 = vld [vmem:[%s264_s18 + $0x20] sm:$0xff] (%p34_p3)  ;;  %299 = vst [vmem:[%s261_s19] sm:$0xff] (%p34_p3), %v298_v0  ;;  %301 = vst [vmem:[%s261_s19 + $0x8] sm:$0xff] (%p34_p3), %v300_v1  ;;  %v304_v3 = vld [vmem:[%s264_s18 + $0x30] sm:$0xff] (%p34_p3) }
  0x13   : > { %303 = vst [vmem:[%s261_s19 + $0x10] sm:$0xff] (%p34_p3), %v302_v2  ;;  %305 = vst [vmem:[%s261_s19 + $0x18] sm:$0xff] (%p34_p3), %v304_v3 }
  0x15 PF: > { %p1454_p5 = scmp.ge.s32.totalorder %s1605_s29, 1  ;;  %p319_p6 = scmp.lt.s32.totalorder %s1605_s29, 3 }
  0x17   : > { %p320_p7 = pnand %p1454_p5, %p319_p6 }
  0x18   : > { %s326_s20 = sand.u32 (!%p320_p7), 1, %s1597_s27   ;;  %v1607_v4 = vmov (!%p320_p7), 0   ;;  %vm430_vm0 = vcmask (!%p320_p7), 261120   ;;  %v1555_v9 = vld [vmem:[%s1964_s2] sm:$0xff] (!%p320_p7)   ;;  %v1556_v10 = vld [vmem:[%s1964_s2 + $0x8] sm:$0xff] (!%p320_p7)   ;;  %v1557_v11 = vld [vmem:[%s1964_s2 + $0x10] sm:$0xff] (!%p320_p7)   ;;  %v712_v49 = vlaneseq (!%p320_p7) }
  0x19   : > { %323 = sbr.rel (%p320_p7) target bundleno = 1043 (0x413), region = 86  ;;  %s1455_s21 = sshll.u32 (!%p320_p7), %s326_s20, 5  ;;  %475 = vmatprep.mubr.bf16.mxu0 (!%p320_p7), %v1607_v4  ;;  %577 = vmatprep.mubr.bf16.mxu1 (!%p320_p7), %v1607_v4  ;;  %v1558_v12 = vld [vmem:[%s1964_s2 + $0x18] sm:$0xff] (!%p320_p7)   ;;  %vm627_vm1 = vcmask (!%p320_p7), 1042432   ;;  %vm875_vm2 = vcmask (!%p320_p7), 1040384   ;;  %vm878_vm3 = vcmask (!%p320_p7), 1041408  }
  0x1a   : > { %s328_s22 = scalar_lea.vmem (!%p320_p7), [#allocation2], %s1455_s21  ;;  %s1456_s14 = sshll.u32 (!%p320_p7), %s1447_s30, 1  ;;  %v1732_v55 = vshrl.u32 (!%p320_p7), %v712_v49, 7  ;;  %vm883_vm4 = vcmask (!%p320_p7), 1043456   ;;  %vm541_vm5 = vcmask (!%p320_p7), 523264   ;;  %vm886_vm6 = vcmask (!%p320_p7), 1044480  }
  0x1b   : > { %v1549_v5 = vld [vmem:[%s328_s22 + $0x4] ss:$8 sps:$4 sm:$0xff] (!%p320_p7)   ;;  %v1551_v6 = vld [vmem:[%s328_s22] ss:$8 sps:$4 sm:$0xff] (!%p320_p7)   ;;  %v1552_v7 = vld [vmem:[%s328_s22 + $0x14] ss:$8 sps:$4 sm:$0xff] (!%p320_p7)  }
  0x1c   : > { %443 = vmatprep.subr.bf16.mxu0 (!%p320_p7), %v1549_v5  ;;  %v1554_v8 = vld [vmem:[%s328_s22 + $0x10] ss:$8 sps:$4 sm:$0xff] (!%p320_p7)   ;;  %p366_p8 = scmp.lt.s32.totalorder (!%p320_p7), %s1456_s14, 3  ;;  %vm889_vm7 = vcmask (!%p320_p7), 1045504   ;;  %vm892_vm8 = vcmask (!%p320_p7), 1046528   ;;  %vm1052_vm9 = vcmask (!%p320_p7), 130048  }
  0x1d   : > { %444 = vmatpush1.bf16.msra.mxu0 (!%p320_p7), %v1551_v6  ;;  %v1745_v6 = vsub.s32 (!%p320_p7), 1, %v1732_v55  ;;  %vm1364_vm14 = vcmp.lt.s32.totalorder (!%p320_p7), %v712_v49, 256 }
  0x1e   : > { %445 = vmatprep.subr.bf16.mxu0 (!%p320_p7), %v1552_v7 }
  0x20   : > { %s1975_s14 = smov (!%p366_p8, %s1456_s14), 3 }
  0x21   : > { %446 = vmatpush1.bf16.msra.mxu0 %v1554_v8  ;;  %s1457_s15 = sshll.u32 %s1975_s14, 2 }
  0x22   : > { %s369_s18 = scalar_lea.vmem %s1963_s1, %s1457_s15  ;;  %s1923_s20 = scalar_lea.vmem %s1970_s8, %s1457_s15 }
  0x23   : > { %v622_v13 = vld [vmem:[%s369_s18] sm:$0x77] }
  0x24   : > { %1468 = vmatmul.mubr.msk.bf16.vlgmr.msra.gmra.mrb[0].mxu0 %vm430_vm0, %v1555_v9  ;;  %v623_v14 = vmul.f32 %v622_v13, %v622_v13  ;;  %v1751_v9 = vsub.s32 5, %v1732_v55 }
  0x25   : > { %485 = vmatprep.mubr.bf16.mxu0 %v1607_v4 }
  0x26   : > { %v625_v15 = vcombine.high %v623_v14, %v623_v14  ;;  %v628_v16 = vsel %vm627_vm1, %v623_v14, 0.0  ;;  %v1759_v14 = vsub.s32 0, %v1732_v55 }
  0x27   : > { %v629_v18 = vrot.slane %v628_v16, 4 }
  0x28   : > { %v635_v17 = vsel %vm627_vm1, %v625_v15, 0.0 }
  0x29   : > { %v636_v19 = vrot.slane %v635_v17, 4  ;;  %v630_v20 = vadd.f32 %v629_v18, %v628_v16 }
  0x2b   : > { %v637_v21 = vadd.f32 %v636_v19, %v635_v17  ;;  %v631_v22 = vrot.slane %v630_v20, 2  ;;  %v1767_v19 = vsub.s32 4, %v1732_v55 }
  0x2c   : > { %1469 = vmatmul.mubr.msk.bf16.gmra.mrb[4].mxu0 %vm430_vm0, %v1556_v10  ;;  %v1754_v10 = vsub.s32 6, %v1732_v55 }
  0x2d   : > { %495 = vmatprep.mubr.bf16.mxu0 %v1607_v4  ;;  %v638_v23 = vrot.slane %v637_v21, 2  ;;  %v632_v24 = vadd.f32 %v631_v22, %v630_v20 }
  0x2f   : > { %v639_v25 = vadd.f32 %v638_v23, %v637_v21  ;;  %v633_v26 = vrot.slane %v632_v24, 1  ;;  %v1772_v23 = vsub.s32 2, %v1732_v55 }
  0x31   : > { %v640_v27 = vrot.slane %v639_v25, 1  ;;  %v634_v28 = vadd.f32 %v633_v26, %v632_v24 }
  0x33   : > { %v641_v29 = vadd.f32 %v640_v27, %v639_v25  ;;  %v642_v30 = vmax.f32 %v634_v28, 1e-24 }
  0x34   : > { %1470 = vmatmul.mubr.msk.bf16.gmra.mrb[8].mxu0 %vm430_vm0, %v1557_v11 }
  0x35   : > { %505 = vmatprep.mubr.bf16.mxu0 %v1607_v4  ;;  %v643_v31 = vmax.f32 %v641_v29, 1e-24  ;;  %1571 = vrsqrt.f32 %v642_v30 }
  0x37   : > { %1573 = vrsqrt.f32 %v643_v31 }
  0x3c   : > { %1471 = vmatmul.mubr.msk.bf16.gmra.mrb[12].mxu0 %vm430_vm0, %v1558_v12 }
  0x3d   : > { %1234 = vmatprep.mubr.bf16.mxu0 %v1607_v4 }
  0x3f   : > { %v1572_v32 = vpop.eup %1571 }
  0x41   : > { %v1574_v33 = vpop.eup %1573 }
  0x42   : > { %v648_v34 = vcombine.low %v1572_v32, %v1574_v33 }
  0x44   : > { %v650_v35 = vmul.f32 %v648_v34, %v622_v13 }
  0x46   : > { %v1721_v36 = vmul.f32 %v650_v35, %v650_v35  ;;  %v1473_v51 = vrot.slane %v650_v35, 9  ;;  %v657_v57 = vrot.slane %v650_v35, 6  ;;  %v1737_v63 = vmul.f32 0.5900436, %v650_v35 }
  0x47   : > { %v1756_v12 = vmul.f32 -0.48860252, %v650_v35  ;;  %v1762_v16 = vmul.f32 0.48860252, %v650_v35  ;;  %v683_v22 = vmul.f32 0.4570458, %v650_v35 }
  0x48   : > { %v669_v38 = vrot.slane %v1721_v36, 5  ;;  %v675_v47 = vmul.f32 -3.0, %v1721_v36  ;;  %v1735_v58 = vmul.f32 5.0, %v1721_v36  ;;  %v656_v62 = vmul.f32 %v1473_v51, %v650_v35 }
  0x49   : > { %v658_v11 = vrot.slane %v657_v57, 4  ;;  %v665_v21 = vmul.f32 0.9461747, %v1721_v36  ;;  %v691_v27 = vmul.f32 0.37317634, %v650_v35  ;;  %v719_v33 = vrot.slane %v1756_v12, %v1751_v9 }
  0x4a   : > { %v670_v46 = vrot.slane %v669_v38, 4  ;;  %v685_v8 = vsub.f32 1.0, %v1735_v58  ;;  %v681_v13 = vmul.f32 2.8906114, %v656_v62  ;;  %v1776_v28 = vmul.f32 1.4453057, %v650_v35 }
  0x4b   : > { %v1774_v25 = vmul.f32 %v658_v11, %v650_v35  ;;  %v1476_v35 = vadd.f32 -3.0, %v1735_v58  ;;  %v703_v51 = vsub.f32 0.0, %v1721_v36 }
  0x4c   : > { %v676_v53 = vadd.f32 %v675_v47, %v670_v46  ;;  %v1740_v2 = vsub.f32 %v1721_v36, %v670_v46  ;;  %v1475_v26 = vrot.slane %v685_v8, 9  ;;  %v682_v32 = vmul.f32 %v681_v13, %v658_v11 }
  0x4d   : > { %v730_v46 = vrot.slane %v1762_v16, %v1754_v10  ;;  %v1794_v47 = vadd.f32 -0.31539157, %v665_v21 }
  0x4e   : > { %v678_v3 = vrot.slane %v676_v53, 7  ;;  %v673_v17 = vmul.f32 0.54627424, %v1740_v2  ;;  %v877_v53 = vsel %vm875_vm2, 0.2820948, %v719_v33  ;;  %v813_v11 = vrot.slane %v682_v32, %v1759_v14 }
  0x50   : > { %v680_v18 = vmul.f32 %v678_v3, %v1737_v63  ;;  %v795_v38 = vrot.slane %v673_v17, %v1767_v19  ;;  %v740_v3 = vrot.slane %v1756_v12, %v1767_v19 }
  0x52   : > { %v802_v57 = vrot.slane %v680_v18, %v1745_v6 }
  0xf7   : > { %v477_v37 = vpop.f32.mrb[0].mxu0 }
  0xf8   : > { %v479_v39 = vpop.f32.mrb[1].mxu0  ;;  %v516_v41 = vmax.f32 %v477_v37, 0.0 }
  0xf9   : > { %v481_v40 = vpop.f32.mrb[2].mxu0  ;;  %v517_v44 = vmax.f32 %v479_v39, 0.0  ;;  %v806_v39 = vrot.slane %v680_v18, %v1751_v9 }
  0xfa   : > { %v518_v42 = vmax.f32 %v481_v40, 0.0  ;;  %v483_v43 = vpop.f32.mrb[3].mxu0 }
  0xfb   : > { %v519_v45 = vmax.f32 %v483_v43, 0.0  ;;  %v896_v58 = vsel %vm875_vm2, %v795_v38, %v806_v39 }
  0xfc   : > { %v1725_v48 = vpack.c.bf16 %v518_v42, %v516_v41  ;;  %v1784_v41 = vmul.f32 1.0925485, %v656_v62  ;;  %v704_v42 = vmul.f32 3.0, %v1721_v36  ;;  %v693_v36 = vmul.f32 %v1476_v35, %v691_v27 }
  0xfd   : > { %v1727_v50 = vpack.c.bf16 %v519_v45, %v517_v44  ;;  %v1790_v44 = vmul.f32 -1.0925485, %v656_v62  ;;  %v690_v45 = vmul.f32 %v1475_v26, %v683_v22  ;;  %v700_v62 = vrot.slane %v1740_v2, 6 }
  0xff   : > { %v487_v52 = vpop.f32.mrb[4].mxu0  ;;  %545 = vmatprep.subr.bf16.mxu1 %v1727_v50  ;;  %v828_v13 = vrot.slane %v690_v45, %v1751_v9 }
 0x100   : > { %v489_v54 = vpop.f32.mrb[5].mxu0  ;;  %546 = vmatpush1.bf16.msra.mxu1 %v1725_v48  ;;  %v520_v59 = vmax.f32 %v487_v52, 0.0  ;;  %v817_v52 = vrot.slane %v682_v32, %v1767_v19  ;;  %v839_v32 = vrot.slane %v693_v36, %v1754_v10 }
 0x101   : > { %v491_v56 = vpop.f32.mrb[6].mxu0  ;;  %v521_v0 = vmax.f32 %v489_v54, 0.0 }
 0x102   : > { %v522_v60 = vmax.f32 %v491_v56, 0.0  ;;  %v493_v61 = vpop.f32.mrb[7].mxu0  ;;  %v791_v56 = vrot.slane %v673_v17, %v1759_v14  ;;  %v898_v21 = vsel %vm878_vm3, %v896_v58, %v817_v52  ;;  %v747_v52 = vrot.slane %v1784_v41, %v1759_v14 }
 0x103   : > { %v523_v1 = vmax.f32 %v493_v61, 0.0  ;;  %v1477_v61 = vrot.slane %v685_v8, 10  ;;  %v726_v8 = vrot.slane %v1762_v16, %v1772_v23  ;;  %v736_v16 = vrot.slane %v1756_v12, %v1759_v14 }
 0x104   : > { %v1742_v5 = vpack.c.bf16 %v522_v60, %v520_v59  ;;  %v715_v59 = vrot.slane %v1756_v12, %v1745_v6  ;;  %v895_v27 = vsel %vm875_vm2, %v791_v56, %v802_v57  ;;  %v900_v39 = vsel %vm627_vm1, %v898_v21, %v828_v13  ;;  %v540_v12 = vld [vmem:[%s1965_s3] sm:$0xf]  ;;  %v1564_v21 = vld [vmem:[%s1966_s4 + $0x8] sm:$0xff]  }
 0x105   : > { %v1747_v7 = vpack.c.bf16 %v523_v1, %v521_v0  ;;  %v1478_v0 = vrot.slane %v704_v42, 9  ;;  %v702_v42 = vmul.f32 %v700_v62, %v1776_v28  ;;  %v667_v56 = vmul.f32 -1.0925485, %v1774_v25 }
 0x106   : > { %v876_v26 = vsel %vm875_vm2, 0.2820948, %v715_v59  ;;  %v773_v58 = vrot.slane %v1794_v47, %v1754_v10 }
 0x107   : > { %v497_v15 = vpop.f32.mrb[8].mxu0  ;;  %547 = vmatprep.subr.bf16.mxu1 %v1747_v7  ;;  %v709_v38 = vadd.f32 %v1478_v0, %v703_v51  ;;  %v879_v35 = vsel %vm878_vm3, %v876_v26, %v726_v8  ;;  %v1565_v8 = vld [vmem:[%s1966_s4 + $0x10] sm:$0xff]  }
 0x108   : > { %v499_v20 = vpop.f32.mrb[9].mxu0  ;;  %548 = vmatpush1.bf16.msra.mxu1 %v1742_v5  ;;  %v524_v29 = vmax.f32 %v497_v15, 0.0  ;;  %v880_v15 = vsel %vm878_vm3, %v877_v53, %v730_v46  ;;  %v762_v46 = vrot.slane %v1790_v44, %v1751_v9  ;;  %v835_v53 = vrot.slane %v693_v36, %v1772_v23 }
 0x109   : > { %v501_v24 = vpop.f32.mrb[10].mxu0  ;;  %v525_v34 = vmax.f32 %v499_v20, 0.0  ;;  %v902_v9 = vsel %vm883_vm4, %v900_v39, %v839_v32  ;;  %v881_v28 = vsel %vm627_vm1, %v879_v35, %v736_v16  ;;  %v710_v57 = vmul.f32 %v709_v38, %v1737_v63 }
 0x10a   : > { %v526_v30 = vmax.f32 %v501_v24, 0.0  ;;  %v503_v31 = vpop.f32.mrb[11].mxu0  ;;  %v884_v25 = vsel %vm883_vm4, %v881_v28, %v747_v52 }
 0x10b   : > { %v527_v37 = vmax.f32 %v503_v31, 0.0  ;;  %v751_v31 = vrot.slane %v1784_v41, %v1767_v19  ;;  %v861_v41 = vrot.slane %v702_v42, %v1754_v10  ;;  %v784_v10 = vrot.slane %v667_v56, %v1767_v19 }
 0x10c   : > { %v1782_v40 = vpack.c.bf16 %v526_v30, %v524_v29  ;;  %v697_v30 = vmul.f32 %v1477_v61, %v683_v22  ;;  %v897_v22 = vsel %vm878_vm3, %v895_v27, %v813_v11 }
 0x10d   : > { %v1788_v43 = vpack.c.bf16 %v527_v37, %v525_v34  ;;  %v882_v34 = vsel %vm627_vm1, %v880_v15, %v740_v3  ;;  %v824_v37 = vrot.slane %v690_v45, %v1745_v6 }
 0x10e   : > { %v850_v45 = vrot.slane %v697_v30, %v1767_v19  ;;  %v885_v51 = vsel %vm883_vm4, %v882_v34, %v751_v31 }
 0x10f   : > { %v507_v54 = vpop.f32.mrb[12].mxu0  ;;  %549 = vmatprep.subr.bf16.mxu1 %v1788_v43  ;;  %v888_v59 = vsel %vm886_vm6, %v885_v51, %v762_v46 }
 0x110   : > { %v509_v60 = vpop.f32.mrb[13].mxu0  ;;  %550 = vmatpush1.bf16.msra.mxu1 %v1782_v40  ;;  %v528_v17 = vmax.f32 %v507_v54, 0.0  ;;  %v899_v54 = vsel %vm627_vm1, %v897_v22, %v824_v37  ;;  %v904_v63 = vsel %vm886_vm6, %v902_v9, %v850_v45  ;;  %v891_v61 = vsel %vm889_vm7, %v888_v59, %v773_v58 }
 0x111   : > { %v511_v1 = vpop.f32.mrb[14].mxu0  ;;  %v529_v2 = vmax.f32 %v509_v60, 0.0  ;;  %v846_v60 = vrot.slane %v697_v30, %v1759_v14  ;;  %v901_v36 = vsel %vm883_vm4, %v899_v54, %v835_v53  ;;  %v906_v62 = vsel %vm889_vm7, %v904_v63, %v861_v41 }
 0x112   : > { %v530_v18 = vmax.f32 %v511_v1, 0.0  ;;  %v513_v20 = vpop.f32.mrb[15].mxu0 }
 0x113   : > { %v531_v24 = vmax.f32 %v513_v20, 0.0  ;;  %v903_v1 = vsel %vm886_vm6, %v901_v36, %v846_v60  ;;  %v1563_v20 = vld [vmem:[%s1966_s4] sm:$0xff]  }
 0x114   : > { %v1817_v29 = vpack.c.bf16 %v530_v18, %v528_v17  ;;  %v1561_v17 = vld [vmem:[%s1967_s5 + $0x10] sm:$0xff]   ;;  %v1562_v18 = vld [vmem:[%s1967_s5 + $0x18] sm:$0xff]  }
 0x115   : > { %v539_v33 = vpack.c.bf16 %v531_v24, %v529_v2  ;;  %v1566_v2 = vld [vmem:[%s1966_s4 + $0x18] sm:$0xff]  }
 0x117   : > { %551 = vmatprep.subr.bf16.mxu1 %v539_v33 }
 0x118   : > { %552 = vmatpush1.bf16.msra.mxu1 %v1817_v29 }
 0x119   : > { %959 = vmatprep.subr.bf16.mxu1 %v1727_v50  ;;  %v758_v50 = vrot.slane %v1790_v44, %v1745_v6  ;;  %v872_v6 = vrot.slane %v710_v57, %v1767_v19  ;;  %v769_v44 = vrot.slane %v1794_v47, %v1772_v23  ;;  %v868_v19 = vrot.slane %v710_v57, %v1759_v14 }
 0x11a   : > { %v894_v47 = vsel %vm892_vm8, %v891_v61, %v784_v10 }
 0x11b   : > { %1472 = vmatmul.mubr.msk.bf16.vlgmr.msra.gmra.mrb[0].mxu1 %vm541_vm5, %v540_v12  ;;  %v887_v0 = vsel %vm886_vm6, %v884_v25, %v758_v50  ;;  %v1608_v12 = vmov 1966171168  }
 0x11c   : > { %960 = vmatpush1.bf16.msra.mxu1 %v1725_v48  ;;  %991 = vmatprep.mubr.bf16.mxu1 %v1607_v4  ;;  %v857_v48 = vrot.slane %v702_v42, %v1772_v23  ;;  %v908_v23 = vsel %vm892_vm8, %v906_v62, %v872_v6  ;;  %v890_v3 = vsel %vm889_vm7, %v887_v0, %v769_v44  ;;  %v1348_v45 = vunpack.c.l.s4 %v1608_v12 }
 0x11d   : > { %961 = vmatprep.subr.bf16.mxu1 %v1747_v7  ;;  %v780_v7 = vrot.slane %v667_v56, %v1759_v14  ;;  %v910_v13 = vpack.c.bf16 %v908_v23, %v894_v47  ;;  %v1559_v14 = vld [vmem:[%s1967_s5] sm:$0xff]  }
 0x11e   : > { %v905_v11 = vsel %vm889_vm7, %v903_v1, %v857_v48  ;;  %v1349_v57 = vunpack.c.0.s8 %v1348_v45  ;;  %v1567_v45 = vld [vmem:[%s1968_s6] sm:$0xff]  }
 0x120   : > { %962 = vmatpush1.bf16.msra.mxu1 %v1742_v5  ;;  %v893_v5 = vsel %vm892_vm8, %v890_v3, %v780_v7  ;;  %v1352_v6 = vsub.s32 %v1349_v57, %v1732_v55 }
 0x121   : > { %963 = vmatprep.subr.bf16.mxu1 %v1788_v43  ;;  %v907_v43 = vsel %vm892_vm8, %v905_v11, %v868_v19 }
 0x122   : > { %v909_v15 = vpack.c.bf16 %v907_v43, %v893_v5 }
 0x124   : > { %964 = vmatpush1.bf16.msra.mxu1 %v1782_v40  ;;  %v1560_v40 = vld [vmem:[%s1967_s5 + $0x8] sm:$0xff]  }
 0x125   : > { %965 = vmatprep.subr.bf16.mxu1 %v539_v33 }
 0x128   : > { %966 = vmatpush1.bf16.msra.mxu1 %v1817_v29 }
 0x129   : > { %1065 = vmatprep.subr.bf16.mxu1 %v910_v13 }
 0x12b   : > { %1483 = vmatmul.mubr.msk.bf16.vlgmr.msra.gmra.mrb[4].mxu1 %vm541_vm5, %v1559_v14 }
 0x12c   : > { %1066 = vmatpush1.bf16.msra.mxu1 %v909_v15  ;;  %1001 = vmatprep.mubr.bf16.mxu1 %v1607_v4 }
 0x133   : > { %1484 = vmatmul.mubr.msk.bf16.gmra.mrb[8].mxu1 %vm541_vm5, %v1560_v40 }
 0x134   : > { %1011 = vmatprep.mubr.bf16.mxu1 %v1607_v4 }
 0x13b   : > { %1485 = vmatmul.mubr.msk.bf16.gmra.mrb[12].mxu1 %vm541_vm5, %v1561_v17 }
 0x13c   : > { %1021 = vmatprep.mubr.bf16.mxu1 %v1607_v4 }
 0x143   : > { %1486 = vmatmul.mubr.msk.bf16.gmra.mrb[16].mxu1 %vm541_vm5, %v1562_v18 }
 0x144   : > { %1097 = vmatprep.mubr.bf16.mxu1 %v1607_v4 }
 0x14b   : > { %1491 = vmatmul.mubr.msk.bf16.vlgmr.msra.gmra.mrb[4].mxu1 %vm1052_vm9, %v1563_v20 }
 0x14c   : > { %1107 = vmatprep.mubr.bf16.mxu1 %v1607_v4 }
 0x153   : > { %1492 = vmatmul.mubr.msk.bf16.gmra.mrb[8].mxu1 %vm1052_vm9, %v1564_v21 }
 0x154   : > { %1117 = vmatprep.mubr.bf16.mxu1 %v1607_v4 }
 0x15b   : > { %1493 = vmatmul.mubr.msk.bf16.gmra.mrb[12].mxu1 %vm1052_vm9, %v1565_v8 }
 0x15c   : > { %1127 = vmatprep.mubr.bf16.mxu1 %v1607_v4 }
 0x163   : > { %1494 = vmatmul.mubr.msk.bf16.gmra.mrb[16].mxu1 %vm1052_vm9, %v1566_v2 }
 0x1ee   : > { %v579_v24 = vpop.f32.mrb[0].mxu1 }
 0x1ef   : > { %v592_v26 = vand.u32 2147483647, %v579_v24  ;;  %v581_v27 = vpop.f32.mrb[1].mxu1  ;;  %v586_v58 = vmax.f32 %v579_v24, 0.0  ;;  %vm588_vm12 = vcmp.ne.f32.partialorder %v579_v24, %v579_v24 }
 0x1f0   : > { %v593_v29 = vand.u32 2147483647, %v581_v27  ;;  %v583_v30 = vpop.f32.mrb[2].mxu1  ;;  %v587_v60 = vmax.f32 %v581_v27, 0.0  ;;  %vm589_vm13 = vcmp.ne.f32.partialorder %v581_v27, %v581_v27 }
 0x1f1   : > { %v594_v31 = vsub.f32 0.0, %v592_v26  ;;  %v584_v32 = vpop.f32.mrb[3].mxu1 }
 0x1f2   : > { %v595_v33 = vsub.f32 0.0, %v593_v29 }
 0x1f3   : > { %v596_v34 = vmul.f32 1.442695, %v594_v31 }
 0x1f4   : > { %v598_v16 = vmul.f32 1.442695, %v595_v33 }
 0x1f5   : > { %1575 = vpow2.f32 %v596_v34 }
 0x1f6   : > { %1577 = vpow2.f32 %v598_v16 }
 0x1ff   : > { %v1576_v37 = vpop.eup %1575 }
 0x200   : > { %v1578_v38 = vpop.eup %1577  ;;  %v600_v39 = vadd.f32 1.0, %v1576_v37  ;;  %v603_v22 = vmul.f32 -0.5, %v1576_v37  ;;  %v606_v51 = vand.u32 2147483647, %v1576_v37 }
 0x201   : > { %v609_v35 = vadd.f32 1.0, %v1578_v38  ;;  %v612_v42 = vmul.f32 -0.5, %v1578_v38  ;;  %v615_v53 = vand.u32 2147483647, %v1578_v38 }
 0x202   : > { %1579 = vlog2.f32 %v600_v39  ;;  %v604_v46 = vadd.f32 1.0, %v603_v22  ;;  %vm607_vm10 = vcmp.lt.f32.partialorder %v606_v51, 0.0004427343  ;;  %v1568_v51 = vld [vmem:[%s1968_s6 + $0x8] sm:$0xff]  }
 0x203   : > { %1581 = vlog2.f32 %v609_v35  ;;  %v613_v52 = vadd.f32 1.0, %v612_v42  ;;  %vm616_vm11 = vcmp.lt.f32.partialorder %v615_v53, 0.0004427343  ;;  %v1570_v53 = vld [vmem:[%s1968_s6 + $0x18] sm:$0xff]  }
 0x204   : > { %v605_v56 = vmul.f32 %v1576_v37, %v604_v46 }
 0x205   : > { %v614_v59 = vmul.f32 %v1578_v38, %v613_v52  ;;  %v1569_v52 = vld [vmem:[%s1968_s6 + $0x10] sm:$0xff]  }
 0x20c   : > { %v1580_v9 = vpop.eup %1579 }
 0x20d   : > { %v1582_v28 = vpop.eup %1581  ;;  %v602_v54 = vmul.f32 0.6931472, %v1580_v9 }
 0x20e   : > { %v611_v41 = vmul.f32 0.6931472, %v1582_v28 }
 0x20f   : > { %v608_v50 = vsel %vm607_vm10, %v605_v56, %v602_v54 }
 0x210   : > { %v618_v63 = vadd.f32 %v608_v50, %v586_v58  ;;  %v617_v25 = vsel %vm616_vm11, %v614_v59, %v611_v41 }
 0x211   : > { %v619_v36 = vadd.f32 %v617_v25, %v587_v60 }
 0x212   : > { %v620_v10 = vsel %vm588_vm12, %v579_v24, %v618_v63 }
 0x213   : > { %v621_v44 = vsel %vm589_vm13, %v581_v27, %v619_v36 }
 0x214   : > { %v1346_v48 = vcombine.low %v620_v10, %v621_v44 }
 0x216   : > { %v1353_v61 = vrot.slane %v1346_v48, %v1352_v6 }
 0x218   : > { %v1360_v62 = vrot.slane %v1353_v61, %v1352_v6 }
 0x21a   : > { %1366 = vst.msk [vmem:[%s1923_s20] ss:$4 sm:$0x3] %vm1364_vm14, %v1360_v62 }
 0x21e   : > { %v1099_v0 = vpop.f32.mrb[4].mxu1 }
 0x21f   : > { %v1101_v1 = vpop.f32.mrb[5].mxu1  ;;  %v1138_v19 = vmax.f32 %v1099_v0, 0.0 }
 0x220   : > { %v1103_v7 = vpop.f32.mrb[6].mxu1  ;;  %v1139_v23 = vmax.f32 %v1101_v1, 0.0 }
 0x221   : > { %v1140_v47 = vmax.f32 %v1103_v7, 0.0  ;;  %v1105_v55 = vpop.f32.mrb[7].mxu1 }
 0x222   : > { %v1141_v3 = vmax.f32 %v1105_v55, 0.0 }
 0x223   : > { %v1154_v11 = vpack.c.bf16 %v1140_v47, %v1138_v19 }
 0x224   : > { %v1155_v13 = vpack.c.bf16 %v1141_v3, %v1139_v23 }
 0x226   : > { %v1109_v5 = vpop.f32.mrb[8].mxu1  ;;  %1202 = vmatprep.subr.bf16.mxu0 %v1155_v13 }
 0x227   : > { %v1111_v43 = vpop.f32.mrb[9].mxu1  ;;  %1203 = vmatpush1.bf16.msra.mxu0 %v1154_v11  ;;  %v1142_v15 = vmax.f32 %v1109_v5, 0.0 }
 0x228   : > { %v1113_v14 = vpop.f32.mrb[10].mxu1  ;;  %v1143_v17 = vmax.f32 %v1111_v43, 0.0 }
 0x229   : > { %v1144_v40 = vmax.f32 %v1113_v14, 0.0  ;;  %v1115_v49 = vpop.f32.mrb[11].mxu1 }
 0x22a   : > { %v1145_v18 = vmax.f32 %v1115_v49, 0.0 }
 0x22b   : > { %v1156_v20 = vpack.c.bf16 %v1144_v40, %v1142_v15 }
 0x22c   : > { %v1157_v21 = vpack.c.bf16 %v1145_v18, %v1143_v17 }
 0x22e   : > { %v1119_v8 = vpop.f32.mrb[12].mxu1  ;;  %1204 = vmatprep.subr.bf16.mxu0 %v1157_v21 }
 0x22f   : > { %v1121_v2 = vpop.f32.mrb[13].mxu1  ;;  %1205 = vmatpush1.bf16.msra.mxu0 %v1156_v20  ;;  %v1146_v26 = vmax.f32 %v1119_v8, 0.0  ;;  %v1299_v8 = vld [vmem:[%s1969_s7] sm:$0x3] }
 0x230   : > { %v1123_v24 = vpop.f32.mrb[14].mxu1  ;;  %v1147_v30 = vmax.f32 %v1121_v2, 0.0 }
 0x231   : > { %v1148_v27 = vmax.f32 %v1123_v24, 0.0  ;;  %v1125_v29 = vpop.f32.mrb[15].mxu1 }
 0x232   : > { %v1149_v31 = vmax.f32 %v1125_v29, 0.0 }
 0x233   : > { %v1158_v32 = vpack.c.bf16 %v1148_v27, %v1146_v26 }
 0x234   : > { %v1159_v33 = vpack.c.bf16 %v1149_v31, %v1147_v30 }
 0x236   : > { %v1129_v34 = vpop.f32.mrb[16].mxu1  ;;  %1206 = vmatprep.subr.bf16.mxu0 %v1159_v33 }
 0x237   : > { %v1131_v16 = vpop.f32.mrb[17].mxu1  ;;  %1207 = vmatpush1.bf16.msra.mxu0 %v1158_v32  ;;  %v1150_v38 = vmax.f32 %v1129_v34, 0.0 }
 0x238   : > { %v1133_v37 = vpop.f32.mrb[18].mxu1  ;;  %v1151_v22 = vmax.f32 %v1131_v16, 0.0 }
 0x239   : > { %v1152_v39 = vmax.f32 %v1133_v37, 0.0  ;;  %v1135_v35 = vpop.f32.mrb[19].mxu1 }
 0x23a   : > { %v1153_v42 = vmax.f32 %v1135_v35, 0.0 }
 0x23b   : > { %v1160_v46 = vpack.c.bf16 %v1152_v39, %v1150_v38 }
 0x23c   : > { %v1161_v12 = vpack.c.bf16 %v1153_v42, %v1151_v22 }
 0x23e   : > { %1208 = vmatprep.subr.bf16.mxu0 %v1161_v12 }
 0x23f   : > { %1209 = vmatpush1.bf16.msra.mxu0 %v1160_v46 }
 0x242   : > { %1499 = vmatmul.mubr.msk.bf16.vlgmr.msra.gmra.mrb[16].mxu0 %vm541_vm5, %v1567_v45 }
 0x243   : > { %1244 = vmatprep.mubr.bf16.mxu0 %v1607_v4 }
 0x24a   : > { %1500 = vmatmul.mubr.msk.bf16.gmra.mrb[20].mxu0 %vm541_vm5, %v1568_v51 }
 0x24b   : > { %1254 = vmatprep.mubr.bf16.mxu0 %v1607_v4 }
 0x252   : > { %1501 = vmatmul.mubr.msk.bf16.gmra.mrb[24].mxu0 %vm541_vm5, %v1569_v52 }
 0x253   : > { %1264 = vmatprep.mubr.bf16.mxu0 %v1607_v4 }
 0x25a   : > { %1502 = vmatmul.mubr.msk.bf16.gmra.mrb[28].mxu0 %vm541_vm5, %v1570_v53 }
 0x25b   : > { %1335 = vmatprep.mubr.bf16.mxu0 %v1607_v4 }
 0x315   : > { %v1236_v9 = vpop.f32.mrb[16].mxu0 }
 0x316   : > { %v1238_v28 = vpop.f32.mrb[17].mxu0  ;;  %v1275_v56 = vmax.f32 %v1236_v9, 0.0 }
 0x317   : > { %v1240_v54 = vpop.f32.mrb[18].mxu0  ;;  %v1276_v41 = vmax.f32 %v1238_v28, 0.0 }
 0x318   : > { %v1277_v57 = vmax.f32 %v1240_v54, 0.0  ;;  %v1242_v58 = vpop.f32.mrb[19].mxu0 }
 0x319   : > { %v1278_v59 = vmax.f32 %v1242_v58, 0.0 }
 0x31a   : > { %v1291_v50 = vpack.c.bf16 %v1277_v57, %v1275_v56 }
 0x31b   : > { %v1292_v60 = vpack.c.bf16 %v1278_v59, %v1276_v41 }
 0x31d   : > { %v1246_v63 = vpop.f32.mrb[20].mxu0  ;;  %1303 = vmatprep.subr.bf16.mxu0 %v1292_v60 }
 0x31e   : > { %v1248_v25 = vpop.f32.mrb[21].mxu0  ;;  %1304 = vmatpush1.bf16.msra.mxu0 %v1291_v50  ;;  %v1279_v10 = vmax.f32 %v1246_v63, 0.0 }
 0x31f   : > { %v1250_v36 = vpop.f32.mrb[22].mxu0  ;;  %v1280_v48 = vmax.f32 %v1248_v25, 0.0 }
 0x320   : > { %v1281_v6 = vmax.f32 %v1250_v36, 0.0  ;;  %v1252_v44 = vpop.f32.mrb[23].mxu0 }
 0x321   : > { %v1282_v4 = vmax.f32 %v1252_v44, 0.0 }
 0x322   : > { %v1293_v61 = vpack.c.bf16 %v1281_v6, %v1279_v10 }
 0x323   : > { %v1294_v62 = vpack.c.bf16 %v1282_v4, %v1280_v48 }
 0x325   : > { %v1256_v0 = vpop.f32.mrb[24].mxu0  ;;  %1305 = vmatprep.subr.bf16.mxu0 %v1294_v62 }
 0x326   : > { %v1258_v1 = vpop.f32.mrb[25].mxu0  ;;  %1306 = vmatpush1.bf16.msra.mxu0 %v1293_v61  ;;  %v1283_v19 = vmax.f32 %v1256_v0, 0.0 }
 0x327   : > { %v1260_v7 = vpop.f32.mrb[26].mxu0  ;;  %v1284_v23 = vmax.f32 %v1258_v1, 0.0 }
 0x328   : > { %v1285_v47 = vmax.f32 %v1260_v7, 0.0  ;;  %v1262_v55 = vpop.f32.mrb[27].mxu0 }
 0x329   : > { %v1286_v3 = vmax.f32 %v1262_v55, 0.0 }
 0x32a   : > { %v1295_v11 = vpack.c.bf16 %v1285_v47, %v1283_v19 }
 0x32b   : > { %v1296_v13 = vpack.c.bf16 %v1286_v3, %v1284_v23 }
 0x32d   : > { %v1266_v5 = vpop.f32.mrb[28].mxu0  ;;  %1307 = vmatprep.subr.bf16.mxu0 %v1296_v13 }
 0x32e   : > { %v1268_v43 = vpop.f32.mrb[29].mxu0  ;;  %1308 = vmatpush1.bf16.msra.mxu0 %v1295_v11  ;;  %v1287_v15 = vmax.f32 %v1266_v5, 0.0 }
 0x32f   : > { %v1270_v14 = vpop.f32.mrb[30].mxu0  ;;  %v1288_v17 = vmax.f32 %v1268_v43, 0.0 }
 0x330   : > { %v1289_v40 = vmax.f32 %v1270_v14, 0.0  ;;  %v1272_v49 = vpop.f32.mrb[31].mxu0 }
 0x331   : > { %v1290_v18 = vmax.f32 %v1272_v49, 0.0 }
 0x332   : > { %v1297_v20 = vpack.c.bf16 %v1289_v40, %v1287_v15 }
 0x333   : > { %v1298_v21 = vpack.c.bf16 %v1290_v18, %v1288_v17 }
 0x335   : > { %1309 = vmatprep.subr.bf16.mxu0 %v1298_v21 }
 0x336   : > { %1310 = vmatpush1.bf16.msra.mxu0 %v1297_v20 }
 0x339   : > { %1503 = vmatmul.mubr.msk.bf16.vlgmr.msra.gmra.mrb[32].mxu0 %vm541_vm5, %v1299_v8 }
 0x40c   : > { %v1337_v2 = vpop.f32.mrb[32].mxu0 }
 0x40d   : > { %v1339_v24 = vpop.f32.mrb[33].mxu0 }
 0x40e   : > { %v1369_v26 = vcombine.low %v1337_v2, %v1339_v24  ;;  %v1341_v27 = vpop.f32.mrb[34].mxu0 }
 0x40f   : > { %v1342_v29 = vpop.f32.mrb[35].mxu0 }
 0x410   : > { %v1370_v30 = vrot.slane %v1369_v26, 7 }
 0x412   : > { %1372 = vst [vmem:[%s1923_s20] sm:$0xee] %v1370_v30 }
 0x413 PF: > { %p15_p9 = scmp.ge.s32.totalorder %s1671_s9, 4   ;;  %s1971_s27 = smov %s1601_s28 }
 0x414   : > { %s1972_s28 = smov %s1680_s12  ;;  %s1973_s29 = smov %s1671_s9 }
 0x415   :  { %17 = sbr.rel (!%p15_p9) target bundleno = 2 (0x2), region = 128 }

// kernel: squeeze.1025
= control target key start
LH: loop header
LB: loop body
LE: loop exit
PB: predicated region body
PF: predicated region fallthrough
CT: control target
= control target key end

     0   :  { %s102_s0 = inlined_call_operand.vmem [shape: f32[384], index: 0, kind: input, shape index: {}]   ;;  %s103_s1 = inlined_call_operand.hbm [shape: f32[2,192], index: 1, kind: output, shape index: {}]  }
   0x1   :  { %v5_v0 = vld [vmem:[%s102_s0] sm:$0xf] }
   0x2   :  { %6 = vst [vmem:[#allocation3] sm:$0xf] %v5_v0 }
   0x3   :  { %2 = vsyncpa [#allocation1], 0  ;;  %vm9_vm0 = vcmask 523264   ;;  %s75_s0 = smov 64   ;;  %vm25_vm1 = vcmask 1048064   ;;  %s76_s8 = smov [#allocation0]  }
   0x4   :  { %s43_s9 = sshll.u32 %s76_s8, 4  ;;  %s44_s9 = int_to_ptr.vmem [resolvable:$true] %s43_s9 }
   0x5   :  { %s51_s10 = scalar_lea.vmem %s44_s9, 64  ;;  %p56_p1 = scmp.lt.s32.totalorder %s44_s9, %s44_s9 }
   0x6   :  { %p52_p0 = scmp.ne.s32.totalorder %s44_s9, %s51_s10  ;;  %p57_p2 = scmp.lt.s32.totalorder %s51_s10, %s51_s10 }
   0x8   :  { %p58_p3 = por %p57_p2, %p56_p1 }
   0x9   :  { %v15_v1 = vld [vmem:[#allocation3 + $0x1] sm:$0x3]   ;;  %v12_v5 = vld [vmem:[#allocation3] sm:$0x1]  }
   0xa   :  { %v17_v2 = vld [vmem:[#allocation3 + $0x2] sm:$0x1]   ;;  %v8_v3 = vld [vmem:[#allocation3 + $0x1] sm:$0x1]   ;;  %13 = vst [vmem:[#allocation2] sm:$0x1] %v12_v5   ;;  %p59_p4 = pnand %p58_p3, %p52_p0 }
   0xb   :  { %v19_v4 = vsel %vm9_vm0, %v17_v2, %v15_v1  ;;  %11 = vst.msk [vmem:[#allocation2 + $0x8] sm:$0x1] %vm9_vm0, %v8_v3  }
   0xc   :  { %20 = vrot.lane.b32.xlu0 %v19_v4, %s75_s0 }
  0x7e   :  { %v21_v6 = vpop.permute.xlu0 %20  }
  0x7f   :  { %24 = vst.msk [vmem:[#allocation2 + $0x1] ss:$8 sm:$0x3] %vm9_vm0, %v21_v6  }
  0x80   :  { %27 = vst.msk [vmem:[#allocation2 + $0x1] sm:$0x1] %vm25_vm1, %v21_v6  }
  0x86   :  { %v35_v7 = vld [vmem:[#allocation2 + $0x8] sm:$0x3] }
  0x87   :  { %v31_v8 = vld [vmem:[#allocation2] sm:$0x3]  ;;  %38 = vst [vmem:[#allocation0 + $0x2] sm:$0x3] %v35_v7 }
  0x88   :  { %33 = vst [vmem:[#allocation0] sm:$0x3] %v31_v8 }
  0x89   :  { %62 = shalt.err (!%p59_p4)
}
  0x8a   :  { %s63_s13 = scalar_lea.hbm %s103_s1, 64 }
  0x8b   :  { %p64_p5 = scmp.ne.s32.totalorder %s103_s1, %s63_s13  ;;  %p67_p6 = scmp.lt.u32.totalorder %s63_s13, %s103_s1 }
  0x8d   :  { %p69_p7 = pnand %p67_p6, %p64_p5 }
  0x8f   :  { %72 = shalt.err (!%p69_p7)
}
  0x90   :  { %46 = dma.vmem_to_hbm [thread:$0]  %s44_s9, 64, %s103_s1, [#allocation1]  }
  0x91   :  { %73 = dma.done.wait [#allocation1], 64  }
  0x92   :  { %74 = vsyncadd [#allocation1], 4294967232 }
  0x93   :  { %48 = vsyncpa [#allocation1], 1 }

</bundles_post_ra>
